<compile_context>
chip_gen: v6e
topology: v6e:2x2x1
jax: 0.10.0
libtpu: 0.0.40
codegen_flags: <defaults>
</compile_context>

<pallas_src>
import jax
import jax.numpy as jnp
from jax.experimental import pallas as pl
from jax.experimental.pallas import tpu as pltpu


def _round_up(n, m):
    return ((n + m - 1) // m) * m


def simplenn_kernel(
    x_ref, pos_ref,                 # [TB, Dx], [TB, Dp]
    w1x_ref, w1p_ref, b1_ref,       # encoder layer 1 (split): [Dx,2H](bf16), [Dp,2H](bf16), [1,2H](f32)
    w2_ref, b2_ref,                 # encoder layer 2 (block-diag): [2H,2H](bf16), [1,2H](f32)
    wc1_ref, bc1_ref,               # classifier layer 1: [2H,H](bf16), [1,H](f32)
    wc2_ref, bc2_ref,               # classifier layer 2: [H,H//2](bf16), [1,H//2](f32)
    wc3_ref, bc3_ref,               # classifier layer 3: [H//2,out_dim](bf16), [1,out_dim](f32)
    out_ref,                        # [TB, out_dim] (f32)
):
    cdt = w1x_ref.dtype  # compute (MXU operand) dtype, bf16

    x = x_ref[...].astype(cdt)
    p = pos_ref[...].astype(cdt)

    # Fused exp/position encoders.  w1x/w1p feed disjoint column halves and w2 is
    # block-diagonal, so `ep` is exactly concat([exp_encoder(x), position_encoder(pos)]).
    h = (
        jnp.dot(x, w1x_ref[...], preferred_element_type=jnp.float32)
        + jnp.dot(p, w1p_ref[...], preferred_element_type=jnp.float32)
        + b1_ref[...]
    )
    h = jnp.maximum(h, 0.0)                                   # ReLU; Dropout = identity
    ep = jnp.dot(h.astype(cdt), w2_ref[...], preferred_element_type=jnp.float32) + b2_ref[...]

    # Classifier: Linear -> ReLU -> Linear -> ReLU -> Linear (Dropouts = identity).
    c = jnp.dot(ep.astype(cdt), wc1_ref[...], preferred_element_type=jnp.float32) + bc1_ref[...]
    c = jnp.maximum(c, 0.0)
    c = jnp.dot(c.astype(cdt), wc2_ref[...], preferred_element_type=jnp.float32) + bc2_ref[...]
    c = jnp.maximum(c, 0.0)
    o = jnp.dot(c.astype(cdt), wc3_ref[...], preferred_element_type=jnp.float32) + bc3_ref[...]

    out_ref[...] = o.astype(out_ref.dtype)


def init_params(key, input_size, pos_dim, out_dim, hidden_dim=64):
    """Original (unfused) parameter shapes, matching the PyTorch module."""
    ks = jax.random.split(key, 14)

    def lin(kw, kb, fan_in, fan_out):
        w = jax.random.normal(kw, (fan_in, fan_out), jnp.float32) / jnp.sqrt(float(fan_in))
        b = jax.random.normal(kb, (1, fan_out), jnp.float32) * 0.1
        return w, b

    p = {}
    p["we1"], p["be1"] = lin(ks[0], ks[1], input_size, hidden_dim)
    p["we2"], p["be2"] = lin(ks[2], ks[3], hidden_dim, hidden_dim)
    p["wp1"], p["bp1"] = lin(ks[4], ks[5], pos_dim, hidden_dim)
    p["wp2"], p["bp2"] = lin(ks[6], ks[7], hidden_dim, hidden_dim)
    p["wc1"], p["bc1"] = lin(ks[8], ks[9], hidden_dim * 2, hidden_dim)
    p["wc2"], p["bc2"] = lin(ks[10], ks[11], hidden_dim, hidden_dim // 2)
    p["wc3"], p["bc3"] = lin(ks[12], ks[13], hidden_dim // 2, out_dim)
    return p


def prepare_fused_params(params, input_size, pos_dim, hidden_dim, out_dim,
                         compute_dtype=jnp.bfloat16):
    """One-time param prep: fuse encoders block-diagonally, cast weights to bf16."""
    H = hidden_dim

    # Encoder layer 1, split by input: x feeds columns [:H], position feeds [H:].
    w1x = jnp.zeros((input_size, 2 * H), jnp.float32).at[:, :H].set(params["we1"])
    w1p = jnp.zeros((pos_dim, 2 * H), jnp.float32).at[:, H:].set(params["wp1"])
    b1 = jnp.concatenate([params["be1"], params["bp1"]], axis=-1)

    # Encoder layer 2: block-diagonal [2H, 2H].
    w2 = jnp.zeros((2 * H, 2 * H), jnp.float32)
    w2 = w2.at[:H, :H].set(params["we2"]).at[H:, H:].set(params["wp2"])
    b2 = jnp.concatenate([params["be2"], params["bp2"]], axis=-1)

    cd = compute_dtype
    fused = dict(
        w1x=w1x.astype(cd), w1p=w1p.astype(cd), b1=b1.astype(jnp.float32),
        w2=w2.astype(cd), b2=b2.astype(jnp.float32),
        wc1=params["wc1"].astype(cd), bc1=params["bc1"].astype(jnp.float32),
        wc2=params["wc2"].astype(cd), bc2=params["bc2"].astype(jnp.float32),
        wc3=params["wc3"].astype(cd), bc3=params["bc3"].astype(jnp.float32),
        out_dim=out_dim,
    )
    return fused


def simplenn_forward(x, position, fused, *, tb=4096,
                     vmem_limit_bytes=48 * 1024 * 1024,
                     single_buffer_weights=True):
    """Batch-tiled Pallas forward.

    tb: batch tile size.  Default 4096 (safe on v7x's 64 MiB VMEM with ~48 MiB scoped
    limit); raise to 8192-16384 on v5e/v6e (128 MiB VMEM) if profiling shows exposed
    per-step overhead.  tb is clamped so tiny batches still form a valid block.
    """
    B, dx = x.shape
    dp = position.shape[1]
    out_dim = int(fused["out_dim"])

    tb = max(8, min((tb // 8) * 8, _round_up(B, 8)))
    grid = (pl.cdiv(B, tb),)

    weights = (
        fused["w1x"], fused["w1p"], fused["b1"],
        fused["w2"], fused["b2"],
        fused["wc1"], fused["bc1"],
        fused["wc2"], fused["bc2"],
        fused["wc3"], fused["bc3"],
    )

    flops = 2 * B * sum(int(w.shape[0]) * int(w.shape[1]) for w in weights)
    bytes_accessed = (
        int(x.size) * x.dtype.itemsize
        + int(position.size) * position.dtype.itemsize
        + sum(int(w.size) * w.dtype.itemsize for w in weights)
        + B * out_dim * 4
    )

    def run(weight_pipeline_mode):
        def resident(arr):
            # Same block index every grid step -> stays VMEM-resident, no re-DMA.
            return pl.BlockSpec(arr.shape, lambda i: (0, 0),
                                pipeline_mode=weight_pipeline_mode)

        in_specs = [
            pl.BlockSpec((tb, dx), lambda i: (i, 0)),
            pl.BlockSpec((tb, dp), lambda i: (i, 0)),
        ] + [resident(w) for w in weights]
        # Last dim == full array dim, so the (8,128) rule is satisfied at out_dim=8.
        out_specs = pl.BlockSpec((tb, out_dim), lambda i: (i, 0))

        return pl.pallas_call(
            simplenn_kernel,
            out_shape=jax.ShapeDtypeStruct((B, out_dim), jnp.float32),
            grid=grid,
            in_specs=in_specs,
            out_specs=out_specs,
            compiler_params=pltpu.CompilerParams(
                dimension_semantics=("parallel",),
                vmem_limit_bytes=vmem_limit_bytes,
            ),
            cost_estimate=pl.CostEstimate(
                flops=flops, transcendentals=0, bytes_accessed=bytes_accessed,
            ),
        )(x, position, *weights)

    if single_buffer_weights:
        try:
            # Constant-index blocks don't need double buffers.
            return run(pl.Buffered(1))
        except Exception:
            pass  # fall back to default double-buffering if Buffered(1) is rejected
    return run(None)


def reference_forward(x, position, params):
    """Pure-JAX f32 reference of the PyTorch forward (dropout = identity), unfused."""
    relu = lambda v: jnp.maximum(v, 0.0)
    e = relu(x @ params["we1"] + params["be1"]) @ params["we2"] + params["be2"]
    p = relu(position @ params["wp1"] + params["bp1"]) @ params["wp2"] + params["bp2"]
    c = jnp.concatenate([e, p], axis=-1)
    c = relu(c @ params["wc1"] + params["bc1"])
    c = relu(c @ params["wc2"] + params["bc2"])
    return c @ params["wc3"] + params["bc3"]


if __name__ == "__main__":
    # B=20 with tb=8 exercises a multi-step grid including a remainder (partial) tile.
    B, input_size, pos_dim, out_dim, hidden_dim = 20, 32, 16, 8, 64

    key = jax.random.PRNGKey(0)
    kx, kp, kparams = jax.random.split(key, 3)
    x = jax.random.normal(kx, (B, input_size), jnp.float32)
    position = jax.random.normal(kp, (B, pos_dim), jnp.float32)

    params = init_params(kparams, input_size, pos_dim, out_dim, hidden_dim)
    fused = prepare_fused_params(params, input_size, pos_dim, hidden_dim, out_dim)

    out = simplenn_forward(x, position, fused, tb=8)
    out = jax.block_until_ready(out)

    ref = reference_forward(x, position, params)
    assert out.shape == (B, out_dim)
    max_err = float(jnp.max(jnp.abs(out - ref)))
    # bf16 operands / f32 accumulation -> loosened tolerance vs. the f32 reference.
    assert jnp.allclose(out, ref, atol=5e-2, rtol=5e-2), max_err
    print("KERNEL_OK")
</pallas_src>

<mosaic_0001>
module attributes {stable_mosaic.version = 11 : i64} {
  func.func @simplenn_kernel(%arg0: i32, %arg1: memref<8x32xf32, #tpu.memory_space<vmem>>, %arg2: memref<8x16xf32, #tpu.memory_space<vmem>>, %arg3: memref<32x128xbf16, #tpu.memory_space<vmem>>, %arg4: memref<16x128xbf16, #tpu.memory_space<vmem>>, %arg5: memref<1x128xf32, #tpu.memory_space<vmem>>, %arg6: memref<128x128xbf16, #tpu.memory_space<vmem>>, %arg7: memref<1x128xf32, #tpu.memory_space<vmem>>, %arg8: memref<128x64xbf16, #tpu.memory_space<vmem>>, %arg9: memref<1x64xf32, #tpu.memory_space<vmem>>, %arg10: memref<64x32xbf16, #tpu.memory_space<vmem>>, %arg11: memref<1x32xf32, #tpu.memory_space<vmem>>, %arg12: memref<32x8xbf16, #tpu.memory_space<vmem>>, %arg13: memref<1x8xf32, #tpu.memory_space<vmem>>, %arg14: memref<8x8xf32, #tpu.memory_space<vmem>>) attributes {dimension_semantics = [#tpu.dimension_semantics<parallel>], iteration_bounds = array<i64: 3>, scalar_prefetch = 0 : i64, scratch_operands = 0 : i64, tpu.core_type = #tpu.core_type<tc>, window_params = [{transform_indices = @transform_0, window_bounds = array<i64: 8, 32>}, {transform_indices = @transform_1, window_bounds = array<i64: 8, 16>}, {pipeline_mode = #tpu.pipeline_mode<synchronous>, transform_indices = @transform_2, window_bounds = array<i64: 32, 128>}, {pipeline_mode = #tpu.pipeline_mode<synchronous>, transform_indices = @transform_3, window_bounds = array<i64: 16, 128>}, {pipeline_mode = #tpu.pipeline_mode<synchronous>, transform_indices = @transform_4, window_bounds = array<i64: 1, 128>}, {pipeline_mode = #tpu.pipeline_mode<synchronous>, transform_indices = @transform_5, window_bounds = array<i64: 128, 128>}, {pipeline_mode = #tpu.pipeline_mode<synchronous>, transform_indices = @transform_6, window_bounds = array<i64: 1, 128>}, {pipeline_mode = #tpu.pipeline_mode<synchronous>, transform_indices = @transform_7, window_bounds = array<i64: 128, 64>}, {pipeline_mode = #tpu.pipeline_mode<synchronous>, transform_indices = @transform_8, window_bounds = array<i64: 1, 64>}, {pipeline_mode = #tpu.pipeline_mode<synchronous>, transform_indices = @transform_9, window_bounds = array<i64: 64, 32>}, {pipeline_mode = #tpu.pipeline_mode<synchronous>, transform_indices = @transform_10, window_bounds = array<i64: 1, 32>}, {pipeline_mode = #tpu.pipeline_mode<synchronous>, transform_indices = @transform_11, window_bounds = array<i64: 32, 8>}, {pipeline_mode = #tpu.pipeline_mode<synchronous>, transform_indices = @transform_12, window_bounds = array<i64: 1, 8>}, {transform_indices = @transform_13, window_bounds = array<i64: 8, 8>}]} {
    %c0 = arith.constant 0 : index
    %c0_0 = arith.constant 0 : index
    %0 = vector.load %arg1[%c0, %c0_0] : memref<8x32xf32, #tpu.memory_space<vmem>>, vector<8x32xf32>
    %1 = arith.truncf %0 : vector<8x32xf32> to vector<8x32xbf16>
    %c0_1 = arith.constant 0 : index
    %c0_2 = arith.constant 0 : index
    %2 = vector.load %arg2[%c0_1, %c0_2] : memref<8x16xf32, #tpu.memory_space<vmem>>, vector<8x16xf32>
    %3 = arith.truncf %2 : vector<8x16xf32> to vector<8x16xbf16>
    %c0_3 = arith.constant 0 : index
    %c0_4 = arith.constant 0 : index
    %4 = vector.load %arg3[%c0_3, %c0_4] : memref<32x128xbf16, #tpu.memory_space<vmem>>, vector<32x128xbf16>
    %cst = arith.constant dense<0.000000e+00> : vector<8x128xf32>
    %5 = tpu.matmul %1, %4, %cst {dimension_numbers = #tpu.dot_dimension_numbers<[1], [0], [0], [1], [0, 0, 1, 1], [], []>} : vector<8x32xbf16>, vector<32x128xbf16>, vector<8x128xf32> -> vector<8x128xf32>
    %c0_5 = arith.constant 0 : index
    %c0_6 = arith.constant 0 : index
    %6 = vector.load %arg4[%c0_5, %c0_6] : memref<16x128xbf16, #tpu.memory_space<vmem>>, vector<16x128xbf16>
    %cst_7 = arith.constant dense<0.000000e+00> : vector<8x128xf32>
    %7 = tpu.matmul %3, %6, %cst_7 {dimension_numbers = #tpu.dot_dimension_numbers<[1], [0], [0], [1], [0, 0, 1, 1], [], []>} : vector<8x16xbf16>, vector<16x128xbf16>, vector<8x128xf32> -> vector<8x128xf32>
    %8 = arith.addf %5, %7 : vector<8x128xf32>
    %c0_8 = arith.constant 0 : index
    %c0_9 = arith.constant 0 : index
    %9 = vector.load %arg5[%c0_8, %c0_9] : memref<1x128xf32, #tpu.memory_space<vmem>>, vector<1x128xf32>
    %10 = vector.broadcast %9 : vector<1x128xf32> to vector<8x128xf32>
    %11 = arith.addf %8, %10 : vector<8x128xf32>
    %cst_10 = arith.constant 0.000000e+00 : f32
    %12 = vector.broadcast %cst_10 : f32 to vector<8x128xf32>
    %13 = arith.maximumf %11, %12 : vector<8x128xf32>
    %14 = arith.truncf %13 : vector<8x128xf32> to vector<8x128xbf16>
    %c0_11 = arith.constant 0 : index
    %c0_12 = arith.constant 0 : index
    %15 = vector.load %arg6[%c0_11, %c0_12] : memref<128x128xbf16, #tpu.memory_space<vmem>>, vector<128x128xbf16>
    %cst_13 = arith.constant dense<0.000000e+00> : vector<8x128xf32>
    %16 = tpu.matmul %14, %15, %cst_13 {dimension_numbers = #tpu.dot_dimension_numbers<[1], [0], [0], [1], [0, 0, 1, 1], [], []>} : vector<8x128xbf16>, vector<128x128xbf16>, vector<8x128xf32> -> vector<8x128xf32>
    %c0_14 = arith.constant 0 : index
    %c0_15 = arith.constant 0 : index
    %17 = vector.load %arg7[%c0_14, %c0_15] : memref<1x128xf32, #tpu.memory_space<vmem>>, vector<1x128xf32>
    %18 = vector.broadcast %17 : vector<1x128xf32> to vector<8x128xf32>
    %19 = arith.addf %16, %18 : vector<8x128xf32>
    %20 = arith.truncf %19 : vector<8x128xf32> to vector<8x128xbf16>
    %c0_16 = arith.constant 0 : index
    %c0_17 = arith.constant 0 : index
    %21 = vector.load %arg8[%c0_16, %c0_17] : memref<128x64xbf16, #tpu.memory_space<vmem>>, vector<128x64xbf16>
    %cst_18 = arith.constant dense<0.000000e+00> : vector<8x64xf32>
    %22 = tpu.matmul %20, %21, %cst_18 {dimension_numbers = #tpu.dot_dimension_numbers<[1], [0], [0], [1], [0, 0, 1, 1], [], []>} : vector<8x128xbf16>, vector<128x64xbf16>, vector<8x64xf32> -> vector<8x64xf32>
    %c0_19 = arith.constant 0 : index
    %c0_20 = arith.constant 0 : index
    %23 = vector.load %arg9[%c0_19, %c0_20] : memref<1x64xf32, #tpu.memory_space<vmem>>, vector<1x64xf32>
    %24 = vector.broadcast %23 : vector<1x64xf32> to vector<8x64xf32>
    %25 = arith.addf %22, %24 : vector<8x64xf32>
    %cst_21 = arith.constant 0.000000e+00 : f32
    %26 = vector.broadcast %cst_21 : f32 to vector<8x64xf32>
    %27 = arith.maximumf %25, %26 : vector<8x64xf32>
    %28 = arith.truncf %27 : vector<8x64xf32> to vector<8x64xbf16>
    %c0_22 = arith.constant 0 : index
    %c0_23 = arith.constant 0 : index
    %29 = vector.load %arg10[%c0_22, %c0_23] : memref<64x32xbf16, #tpu.memory_space<vmem>>, vector<64x32xbf16>
    %cst_24 = arith.constant dense<0.000000e+00> : vector<8x32xf32>
    %30 = tpu.matmul %28, %29, %cst_24 {dimension_numbers = #tpu.dot_dimension_numbers<[1], [0], [0], [1], [0, 0, 1, 1], [], []>} : vector<8x64xbf16>, vector<64x32xbf16>, vector<8x32xf32> -> vector<8x32xf32>
    %c0_25 = arith.constant 0 : index
    %c0_26 = arith.constant 0 : index
    %31 = vector.load %arg11[%c0_25, %c0_26] : memref<1x32xf32, #tpu.memory_space<vmem>>, vector<1x32xf32>
    %32 = vector.broadcast %31 : vector<1x32xf32> to vector<8x32xf32>
    %33 = arith.addf %30, %32 : vector<8x32xf32>
    %cst_27 = arith.constant 0.000000e+00 : f32
    %34 = vector.broadcast %cst_27 : f32 to vector<8x32xf32>
    %35 = arith.maximumf %33, %34 : vector<8x32xf32>
    %36 = arith.truncf %35 : vector<8x32xf32> to vector<8x32xbf16>
    %c0_28 = arith.constant 0 : index
    %c0_29 = arith.constant 0 : index
    %37 = vector.load %arg12[%c0_28, %c0_29] : memref<32x8xbf16, #tpu.memory_space<vmem>>, vector<32x8xbf16>
    %cst_30 = arith.constant dense<0.000000e+00> : vector<8x8xf32>
    %38 = tpu.matmul %36, %37, %cst_30 {dimension_numbers = #tpu.dot_dimension_numbers<[1], [0], [0], [1], [0, 0, 1, 1], [], []>} : vector<8x32xbf16>, vector<32x8xbf16>, vector<8x8xf32> -> vector<8x8xf32>
    %c0_31 = arith.constant 0 : index
    %c0_32 = arith.constant 0 : index
    %39 = vector.load %arg13[%c0_31, %c0_32] : memref<1x8xf32, #tpu.memory_space<vmem>>, vector<1x8xf32>
    %40 = vector.broadcast %39 : vector<1x8xf32> to vector<8x8xf32>
    %41 = arith.addf %38, %40 : vector<8x8xf32>
    %c0_33 = arith.constant 0 : index
    %c0_34 = arith.constant 0 : index
    %42 = vector.load %arg14[%c0_33, %c0_34] : memref<8x8xf32, #tpu.memory_space<vmem>>, vector<8x8xf32>
    tpu.vector_store %arg14[%c0_33, %c0_34], %41 {strides = array<i32>} : memref<8x8xf32, #tpu.memory_space<vmem>>, vector<8x8xf32>,
    return
  }
  func.func @transform_0(%arg0: i32) -> (i32, i32) {
    %c0_i32 = arith.constant 0 : i32
    %c0_i32_0 = arith.constant 0 : i32
    return %arg0, %c0_i32 : i32, i32
  }
  func.func @transform_1(%arg0: i32) -> (i32, i32) {
    %c0_i32 = arith.constant 0 : i32
    %c0_i32_0 = arith.constant 0 : i32
    return %arg0, %c0_i32 : i32, i32
  }
  func.func @transform_2(%arg0: i32) -> (i32, i32) {
    %c0_i32 = arith.constant 0 : i32
    %c0_i32_0 = arith.constant 0 : i32
    %c0_i32_1 = arith.constant 0 : i32
    return %c0_i32, %c0_i32_0 : i32, i32
  }
  func.func @transform_3(%arg0: i32) -> (i32, i32) {
    %c0_i32 = arith.constant 0 : i32
    %c0_i32_0 = arith.constant 0 : i32
    %c0_i32_1 = arith.constant 0 : i32
    return %c0_i32, %c0_i32_0 : i32, i32
  }
  func.func @transform_4(%arg0: i32) -> (i32, i32) {
    %c0_i32 = arith.constant 0 : i32
    %c0_i32_0 = arith.constant 0 : i32
    %c0_i32_1 = arith.constant 0 : i32
    return %c0_i32, %c0_i32_0 : i32, i32
  }
  func.func @transform_5(%arg0: i32) -> (i32, i32) {
    %c0_i32 = arith.constant 0 : i32
    %c0_i32_0 = arith.constant 0 : i32
    %c0_i32_1 = arith.constant 0 : i32
    return %c0_i32, %c0_i32_0 : i32, i32
  }
  func.func @transform_6(%arg0: i32) -> (i32, i32) {
    %c0_i32 = arith.constant 0 : i32
    %c0_i32_0 = arith.constant 0 : i32
    %c0_i32_1 = arith.constant 0 : i32
    return %c0_i32, %c0_i32_0 : i32, i32
  }
  func.func @transform_7(%arg0: i32) -> (i32, i32) {
    %c0_i32 = arith.constant 0 : i32
    %c0_i32_0 = arith.constant 0 : i32
    %c0_i32_1 = arith.constant 0 : i32
    return %c0_i32, %c0_i32_0 : i32, i32
  }
  func.func @transform_8(%arg0: i32) -> (i32, i32) {
    %c0_i32 = arith.constant 0 : i32
    %c0_i32_0 = arith.constant 0 : i32
    %c0_i32_1 = arith.constant 0 : i32
    return %c0_i32, %c0_i32_0 : i32, i32
  }
  func.func @transform_9(%arg0: i32) -> (i32, i32) {
    %c0_i32 = arith.constant 0 : i32
    %c0_i32_0 = arith.constant 0 : i32
    %c0_i32_1 = arith.constant 0 : i32
    return %c0_i32, %c0_i32_0 : i32, i32
  }
  func.func @transform_10(%arg0: i32) -> (i32, i32) {
    %c0_i32 = arith.constant 0 : i32
    %c0_i32_0 = arith.constant 0 : i32
    %c0_i32_1 = arith.constant 0 : i32
    return %c0_i32, %c0_i32_0 : i32, i32
  }
  func.func @transform_11(%arg0: i32) -> (i32, i32) {
    %c0_i32 = arith.constant 0 : i32
    %c0_i32_0 = arith.constant 0 : i32
    %c0_i32_1 = arith.constant 0 : i32
    return %c0_i32, %c0_i32_0 : i32, i32
  }
  func.func @transform_12(%arg0: i32) -> (i32, i32) {
    %c0_i32 = arith.constant 0 : i32
    %c0_i32_0 = arith.constant 0 : i32
    %c0_i32_1 = arith.constant 0 : i32
    return %c0_i32, %c0_i32_0 : i32, i32
  }
  func.func @transform_13(%arg0: i32) -> (i32, i32) {
    %c0_i32 = arith.constant 0 : i32
    %c0_i32_0 = arith.constant 0 : i32
    return %arg0, %c0_i32 : i32, i32
  }
}

module attributes {stable_mosaic.version = 11 : i64} {
  func.func @simplenn_kernel(%arg0: i32, %arg1: memref<8x32xf32, #tpu.memory_space<vmem>>, %arg2: memref<8x16xf32, #tpu.memory_space<vmem>>, %arg3: memref<32x128xbf16, #tpu.memory_space<vmem>>, %arg4: memref<16x128xbf16, #tpu.memory_space<vmem>>, %arg5: memref<1x128xf32, #tpu.memory_space<vmem>>, %arg6: memref<128x128xbf16, #tpu.memory_space<vmem>>, %arg7: memref<1x128xf32, #tpu.memory_space<vmem>>, %arg8: memref<128x64xbf16, #tpu.memory_space<vmem>>, %arg9: memref<1x64xf32, #tpu.memory_space<vmem>>, %arg10: memref<64x32xbf16, #tpu.memory_space<vmem>>, %arg11: memref<1x32xf32, #tpu.memory_space<vmem>>, %arg12: memref<32x8xbf16, #tpu.memory_space<vmem>>, %arg13: memref<1x8xf32, #tpu.memory_space<vmem>>, %arg14: memref<8x8xf32, #tpu.memory_space<vmem>>) attributes {dimension_semantics = [#tpu.dimension_semantics<parallel>], iteration_bounds = array<i64: 3>, scalar_prefetch = 0 : i64, scratch_operands = 0 : i64, tpu.core_type = #tpu.core_type<tc>, window_params = [{transform_indices = @transform_0, window_bounds = array<i64: 8, 32>}, {transform_indices = @transform_1, window_bounds = array<i64: 8, 16>}, {pipeline_mode = #tpu.pipeline_mode<synchronous>, transform_indices = @transform_2, window_bounds = array<i64: 32, 128>}, {pipeline_mode = #tpu.pipeline_mode<synchronous>, transform_indices = @transform_3, window_bounds = array<i64: 16, 128>}, {pipeline_mode = #tpu.pipeline_mode<synchronous>, transform_indices = @transform_4, window_bounds = array<i64: 1, 128>}, {pipeline_mode = #tpu.pipeline_mode<synchronous>, transform_indices = @transform_5, window_bounds = array<i64: 128, 128>}, {pipeline_mode = #tpu.pipeline_mode<synchronous>, transform_indices = @transform_6, window_bounds = array<i64: 1, 128>}, {pipeline_mode = #tpu.pipeline_mode<synchronous>, transform_indices = @transform_7, window_bounds = array<i64: 128, 64>}, {pipeline_mode = #tpu.pipeline_mode<synchronous>, transform_indices = @transform_8, window_bounds = array<i64: 1, 64>}, {pipeline_mode = #tpu.pipeline_mode<synchronous>, transform_indices = @transform_9, window_bounds = array<i64: 64, 32>}, {pipeline_mode = #tpu.pipeline_mode<synchronous>, transform_indices = @transform_10, window_bounds = array<i64: 1, 32>}, {pipeline_mode = #tpu.pipeline_mode<synchronous>, transform_indices = @transform_11, window_bounds = array<i64: 32, 8>}, {pipeline_mode = #tpu.pipeline_mode<synchronous>, transform_indices = @transform_12, window_bounds = array<i64: 1, 8>}, {transform_indices = @transform_13, window_bounds = array<i64: 8, 8>}]} {
    %c0 = arith.constant 0 : index
    %c0_0 = arith.constant 0 : index
    %0 = vector.load %arg1[%c0, %c0_0] : memref<8x32xf32, #tpu.memory_space<vmem>>, vector<8x32xf32>
    %1 = arith.truncf %0 : vector<8x32xf32> to vector<8x32xbf16>
    %c0_1 = arith.constant 0 : index
    %c0_2 = arith.constant 0 : index
    %2 = vector.load %arg2[%c0_1, %c0_2] : memref<8x16xf32, #tpu.memory_space<vmem>>, vector<8x16xf32>
    %3 = arith.truncf %2 : vector<8x16xf32> to vector<8x16xbf16>
    %c0_3 = arith.constant 0 : index
    %c0_4 = arith.constant 0 : index
    %4 = vector.load %arg3[%c0_3, %c0_4] : memref<32x128xbf16, #tpu.memory_space<vmem>>, vector<32x128xbf16>
    %cst = arith.constant dense<0.000000e+00> : vector<8x128xf32>
    %5 = tpu.matmul %1, %4, %cst {dimension_numbers = #tpu.dot_dimension_numbers<[1], [0], [0], [1], [0, 0, 1, 1], [], []>} : vector<8x32xbf16>, vector<32x128xbf16>, vector<8x128xf32> -> vector<8x128xf32>
    %c0_5 = arith.constant 0 : index
    %c0_6 = arith.constant 0 : index
    %6 = vector.load %arg4[%c0_5, %c0_6] : memref<16x128xbf16, #tpu.memory_space<vmem>>, vector<16x128xbf16>
    %cst_7 = arith.constant dense<0.000000e+00> : vector<8x128xf32>
    %7 = tpu.matmul %3, %6, %cst_7 {dimension_numbers = #tpu.dot_dimension_numbers<[1], [0], [0], [1], [0, 0, 1, 1], [], []>} : vector<8x16xbf16>, vector<16x128xbf16>, vector<8x128xf32> -> vector<8x128xf32>
    %8 = arith.addf %5, %7 : vector<8x128xf32>
    %c0_8 = arith.constant 0 : index
    %c0_9 = arith.constant 0 : index
    %9 = vector.load %arg5[%c0_8, %c0_9] : memref<1x128xf32, #tpu.memory_space<vmem>>, vector<1x128xf32>
    %10 = vector.broadcast %9 : vector<1x128xf32> to vector<8x128xf32>
    %11 = arith.addf %8, %10 : vector<8x128xf32>
    %cst_10 = arith.constant 0.000000e+00 : f32
    %12 = vector.broadcast %cst_10 : f32 to vector<8x128xf32>
    %13 = arith.maximumf %11, %12 : vector<8x128xf32>
    %14 = arith.truncf %13 : vector<8x128xf32> to vector<8x128xbf16>
    %c0_11 = arith.constant 0 : index
    %c0_12 = arith.constant 0 : index
    %15 = vector.load %arg6[%c0_11, %c0_12] : memref<128x128xbf16, #tpu.memory_space<vmem>>, vector<128x128xbf16>
    %cst_13 = arith.constant dense<0.000000e+00> : vector<8x128xf32>
    %16 = tpu.matmul %14, %15, %cst_13 {dimension_numbers = #tpu.dot_dimension_numbers<[1], [0], [0], [1], [0, 0, 1, 1], [], []>} : vector<8x128xbf16>, vector<128x128xbf16>, vector<8x128xf32> -> vector<8x128xf32>
    %c0_14 = arith.constant 0 : index
    %c0_15 = arith.constant 0 : index
    %17 = vector.load %arg7[%c0_14, %c0_15] : memref<1x128xf32, #tpu.memory_space<vmem>>, vector<1x128xf32>
    %18 = vector.broadcast %17 : vector<1x128xf32> to vector<8x128xf32>
    %19 = arith.addf %16, %18 : vector<8x128xf32>
    %20 = arith.truncf %19 : vector<8x128xf32> to vector<8x128xbf16>
    %c0_16 = arith.constant 0 : index
    %c0_17 = arith.constant 0 : index
    %21 = vector.load %arg8[%c0_16, %c0_17] : memref<128x64xbf16, #tpu.memory_space<vmem>>, vector<128x64xbf16>
    %cst_18 = arith.constant dense<0.000000e+00> : vector<8x64xf32>
    %22 = tpu.matmul %20, %21, %cst_18 {dimension_numbers = #tpu.dot_dimension_numbers<[1], [0], [0], [1], [0, 0, 1, 1], [], []>} : vector<8x128xbf16>, vector<128x64xbf16>, vector<8x64xf32> -> vector<8x64xf32>
    %c0_19 = arith.constant 0 : index
    %c0_20 = arith.constant 0 : index
    %23 = vector.load %arg9[%c0_19, %c0_20] : memref<1x64xf32, #tpu.memory_space<vmem>>, vector<1x64xf32>
    %24 = vector.broadcast %23 : vector<1x64xf32> to vector<8x64xf32>
    %25 = arith.addf %22, %24 : vector<8x64xf32>
    %cst_21 = arith.constant 0.000000e+00 : f32
    %26 = vector.broadcast %cst_21 : f32 to vector<8x64xf32>
    %27 = arith.maximumf %25, %26 : vector<8x64xf32>
    %28 = arith.truncf %27 : vector<8x64xf32> to vector<8x64xbf16>
    %c0_22 = arith.constant 0 : index
    %c0_23 = arith.constant 0 : index
    %29 = vector.load %arg10[%c0_22, %c0_23] : memref<64x32xbf16, #tpu.memory_space<vmem>>, vector<64x32xbf16>
    %cst_24 = arith.constant dense<0.000000e+00> : vector<8x32xf32>
    %30 = tpu.matmul %28, %29, %cst_24 {dimension_numbers = #tpu.dot_dimension_numbers<[1], [0], [0], [1], [0, 0, 1, 1], [], []>} : vector<8x64xbf16>, vector<64x32xbf16>, vector<8x32xf32> -> vector<8x32xf32>
    %c0_25 = arith.constant 0 : index
    %c0_26 = arith.constant 0 : index
    %31 = vector.load %arg11[%c0_25, %c0_26] : memref<1x32xf32, #tpu.memory_space<vmem>>, vector<1x32xf32>
    %32 = vector.broadcast %31 : vector<1x32xf32> to vector<8x32xf32>
    %33 = arith.addf %30, %32 : vector<8x32xf32>
    %cst_27 = arith.constant 0.000000e+00 : f32
    %34 = vector.broadcast %cst_27 : f32 to vector<8x32xf32>
    %35 = arith.maximumf %33, %34 : vector<8x32xf32>
    %36 = arith.truncf %35 : vector<8x32xf32> to vector<8x32xbf16>
    %c0_28 = arith.constant 0 : index
    %c0_29 = arith.constant 0 : index
    %37 = vector.load %arg12[%c0_28, %c0_29] : memref<32x8xbf16, #tpu.memory_space<vmem>>, vector<32x8xbf16>
    %cst_30 = arith.constant dense<0.000000e+00> : vector<8x8xf32>
    %38 = tpu.matmul %36, %37, %cst_30 {dimension_numbers = #tpu.dot_dimension_numbers<[1], [0], [0], [1], [0, 0, 1, 1], [], []>} : vector<8x32xbf16>, vector<32x8xbf16>, vector<8x8xf32> -> vector<8x8xf32>
    %c0_31 = arith.constant 0 : index
    %c0_32 = arith.constant 0 : index
    %39 = vector.load %arg13[%c0_31, %c0_32] : memref<1x8xf32, #tpu.memory_space<vmem>>, vector<1x8xf32>
    %40 = vector.broadcast %39 : vector<1x8xf32> to vector<8x8xf32>
    %41 = arith.addf %38, %40 : vector<8x8xf32>
    %c0_33 = arith.constant 0 : index
    %c0_34 = arith.constant 0 : index
    %42 = vector.load %arg14[%c0_33, %c0_34] : memref<8x8xf32, #tpu.memory_space<vmem>>, vector<8x8xf32>
    tpu.vector_store %arg14[%c0_33, %c0_34], %41 {strides = array<i32>} : memref<8x8xf32, #tpu.memory_space<vmem>>, vector<8x8xf32>,
    return
  }
  func.func @transform_0(%arg0: i32) -> (i32, i32) {
    %c0_i32 = arith.constant 0 : i32
    %c0_i32_0 = arith.constant 0 : i32
    return %arg0, %c0_i32 : i32, i32
  }
  func.func @transform_1(%arg0: i32) -> (i32, i32) {
    %c0_i32 = arith.constant 0 : i32
    %c0_i32_0 = arith.constant 0 : i32
    return %arg0, %c0_i32 : i32, i32
  }
  func.func @transform_2(%arg0: i32) -> (i32, i32) {
    %c0_i32 = arith.constant 0 : i32
    %c0_i32_0 = arith.constant 0 : i32
    %c0_i32_1 = arith.constant 0 : i32
    return %c0_i32, %c0_i32_0 : i32, i32
  }
  func.func @transform_3(%arg0: i32) -> (i32, i32) {
    %c0_i32 = arith.constant 0 : i32
    %c0_i32_0 = arith.constant 0 : i32
    %c0_i32_1 = arith.constant 0 : i32
    return %c0_i32, %c0_i32_0 : i32, i32
  }
  func.func @transform_4(%arg0: i32) -> (i32, i32) {
    %c0_i32 = arith.constant 0 : i32
    %c0_i32_0 = arith.constant 0 : i32
    %c0_i32_1 = arith.constant 0 : i32
    return %c0_i32, %c0_i32_0 : i32, i32
  }
  func.func @transform_5(%arg0: i32) -> (i32, i32) {
    %c0_i32 = arith.constant 0 : i32
    %c0_i32_0 = arith.constant 0 : i32
    %c0_i32_1 = arith.constant 0 : i32
    return %c0_i32, %c0_i32_0 : i32, i32
  }
  func.func @transform_6(%arg0: i32) -> (i32, i32) {
    %c0_i32 = arith.constant 0 : i32
    %c0_i32_0 = arith.constant 0 : i32
    %c0_i32_1 = arith.constant 0 : i32
    return %c0_i32, %c0_i32_0 : i32, i32
  }
  func.func @transform_7(%arg0: i32) -> (i32, i32) {
    %c0_i32 = arith.constant 0 : i32
    %c0_i32_0 = arith.constant 0 : i32
    %c0_i32_1 = arith.constant 0 : i32
    return %c0_i32, %c0_i32_0 : i32, i32
  }
  func.func @transform_8(%arg0: i32) -> (i32, i32) {
    %c0_i32 = arith.constant 0 : i32
    %c0_i32_0 = arith.constant 0 : i32
    %c0_i32_1 = arith.constant 0 : i32
    return %c0_i32, %c0_i32_0 : i32, i32
  }
  func.func @transform_9(%arg0: i32) -> (i32, i32) {
    %c0_i32 = arith.constant 0 : i32
    %c0_i32_0 = arith.constant 0 : i32
    %c0_i32_1 = arith.constant 0 : i32
    return %c0_i32, %c0_i32_0 : i32, i32
  }
  func.func @transform_10(%arg0: i32) -> (i32, i32) {
    %c0_i32 = arith.constant 0 : i32
    %c0_i32_0 = arith.constant 0 : i32
    %c0_i32_1 = arith.constant 0 : i32
    return %c0_i32, %c0_i32_0 : i32, i32
  }
  func.func @transform_11(%arg0: i32) -> (i32, i32) {
    %c0_i32 = arith.constant 0 : i32
    %c0_i32_0 = arith.constant 0 : i32
    %c0_i32_1 = arith.constant 0 : i32
    return %c0_i32, %c0_i32_0 : i32, i32
  }
  func.func @transform_12(%arg0: i32) -> (i32, i32) {
    %c0_i32 = arith.constant 0 : i32
    %c0_i32_0 = arith.constant 0 : i32
    %c0_i32_1 = arith.constant 0 : i32
    return %c0_i32, %c0_i32_0 : i32, i32
  }
  func.func @transform_13(%arg0: i32) -> (i32, i32) {
    %c0_i32 = arith.constant 0 : i32
    %c0_i32_0 = arith.constant 0 : i32
    return %arg0, %c0_i32 : i32, i32
  }
}

</mosaic_0001>

<bundles_post_ra>
// kernel: tpu_custom_call.1
= control target key start
LH: loop header
LB: loop body
LE: loop exit
PB: predicated region body
PF: predicated region fallthrough
CT: control target
= control target key end

     0   :  { %s1287_s25 = smov 0   ;;  %s1441_s0 = inlined_call_operand.vmem [shape: f32[20,32], index: 0, kind: input, shape index: {}]   ;;  %s1442_s1 = inlined_call_operand.vmem [shape: f32[20,16], index: 1, kind: input, shape index: {}]   ;;  %s1443_s2 = inlined_call_operand.vmem [shape: bf16[32,128], index: 2, kind: input, shape index: {}]   ;;  %s1444_s3 = inlined_call_operand.vmem [shape: bf16[16,128], index: 3, kind: input, shape index: {}]   ;;  %s1445_s4 = inlined_call_operand.vmem [shape: f32[1,128], index: 4, kind: input, shape index: {}]   ;;  %s1446_s5 = inlined_call_operand.vmem [shape: bf16[128,128], index: 5, kind: input, shape index: {}]   ;;  %s1447_s6 = inlined_call_operand.vmem [shape: f32[1,128], index: 6, kind: input, shape index: {}]   ;;  %s1448_s7 = inlined_call_operand.vmem [shape: bf16[128,64], index: 7, kind: input, shape index: {}]   ;;  %s1449_s8 = inlined_call_operand.vmem [shape: f32[1,64], index: 8, kind: input, shape index: {}]   ;;  %s1450_s9 = inlined_call_operand.vmem [shape: bf16[64,32], index: 9, kind: input, shape index: {}]   ;;  %s1451_s10 = inlined_call_operand.vmem [shape: f32[1,32], index: 10, kind: input, shape index: {}]   ;;  %s1452_s11 = inlined_call_operand.vmem [shape: bf16[32,8], index: 11, kind: input, shape index: {}]   ;;  %s1453_s12 = inlined_call_operand.vmem [shape: f32[1,8], index: 12, kind: input, shape index: {}]   ;;  %s1454_s13 = inlined_call_operand.vmem [shape: f32[20,8], index: 13, kind: output, shape index: {}]  }
   0x1 LB: > { %s1023_s26 = sadd.s32 4294967295, %s1213_s25   ;;  %p1027_p0 = scmp.ge.s32.totalorder %s1213_s25, 1  ;;  %s1213_s25 = sphi %s1287_s25, %s23_s25  }
   0x2   : > { %p395_p1 = scmp.lt.s32.totalorder %s1213_s25, 4 }
   0x4   : > { %p396_p2 = pnand %p1027_p0, %p395_p1 }
   0x5   : > { %p441_p3 = scmp.lt.s32.totalorder (!%p396_p2), %s1023_s26, 2 }
   0x6   : > { %399 = sbr.rel (%p396_p2) target bundleno = 1015 (0x3f7), region = 72 }
   0xb   : > { %v1182_v0 = vld [vmem:[%s1443_s2 + $0x8] sm:$0xff]   ;;  %v1215_v1 = vmov 0.0   ;;  %v1183_v2 = vld [vmem:[%s1444_s3] sm:$0xff]   ;;  %vm1216_vm0 = vmmov 0   ;;  %s1456_s26 = smov (!%p441_p3, %s1023_s26), 2  ;;  %vm470_vm1 = vcmask 130048  }
   0xc   : > { %1104 = vmatprep.subr.bf16.mxu1 %v1215_v1  ;;  %1098 = vmatprep.subr.bf16.mxu0 %v1215_v1  ;;  %v1184_v3 = vld [vmem:[%s1443_s2] sm:$0xff]   ;;  %s1312_s16 = sshll.u32 %s1456_s26, 3  ;;  %vm526_vm2 = vcmask 261120   ;;  %v1185_v6 = vld [vmem:[%s1446_s5 + $0x38] sm:$0xff]   ;;  %v1186_v9 = vld [vmem:[%s1446_s5 + $0x30] sm:$0xff]   ;;  %vm844_vm3 = vcmask 523264  }
   0xd   : > { %1105 = vmatpush3.bf16.msra.mxu1 %v1182_v0  ;;  %1100 = vmatprep.mubr.msk.bf16.mxu0 %vm1216_vm0, %v1215_v1  ;;  %s448_s19 = scalar_lea.vmem %s1442_s1, %s1312_s16  ;;  %s444_s22 = scalar_lea.vmem %s1441_s0, %s1312_s16  ;;  %v1187_v10 = vld [vmem:[%s1446_s5 + $0x28] sm:$0xff]   ;;  %v1188_v11 = vld [vmem:[%s1446_s5 + $0x20] sm:$0xff]   ;;  %v1189_v12 = vld [vmem:[%s1446_s5 + $0x18] sm:$0xff]   ;;  %vm956_vm4 = vcmask 64512  }
   0xe   : > { %1099 = vmatpush3.bf16.msra.mxu0 %v1183_v2  ;;  %1106 = vmatprep.subr.bf16.mxu1 %v1215_v1  ;;  %v456_v4 = vld [vmem:[%s448_s19] sm:$0xff]  ;;  %v1190_v13 = vld [vmem:[%s1446_s5 + $0x10] sm:$0xff]   ;;  %v1191_v14 = vld [vmem:[%s1446_s5 + $0x8] sm:$0xff]   ;;  %s452_s19 = scalar_lea.vmem %s1454_s13, %s1312_s16 }
   0xf   : > { %1108 = vmatprep.mubr.msk.bf16.mxu1 %vm1216_vm0, %v1215_v1  ;;  %1112 = vmatprep.subr.bf16.mxu0 %v1215_v1  ;;  %v454_v5 = vld [vmem:[%s444_s22] sm:$0xff]  ;;  %v457_v7 = vpack.c.bf16 %v456_v4, %v456_v4  ;;  %v1193_v16 = vld [vmem:[%s1448_s7 + $0x38] sm:$0xff]   ;;  %v1194_v17 = vld [vmem:[%s1448_s7 + $0x30] sm:$0xff]  }
  0x10   : > { %v455_v8 = vpack.c.bf16 %v454_v5, %v454_v5  ;;  %v1192_v15 = vld [vmem:[%s1446_s5] sm:$0xff]   ;;  %v1195_v18 = vld [vmem:[%s1448_s7 + $0x28] sm:$0xff]   ;;  %v1197_v20 = vld [vmem:[%s1448_s7 + $0x18] sm:$0xff]  }
  0x11   : > { %1107 = vmatpush3.bf16.msra.mxu1 %v1184_v3  ;;  %1101 = vmatmul.mubr.msk.bf16.vlgmr.msra.gmra.mxu0 %vm470_vm1, %v457_v7  ;;  %v1196_v19 = vld [vmem:[%s1448_s7 + $0x20] sm:$0xff]   ;;  %v1198_v21 = vld [vmem:[%s1448_s7 + $0x10] sm:$0xff]   ;;  %v1199_v22 = vld [vmem:[%s1448_s7 + $0x8] sm:$0xff]  }
  0x12   : > { %1132 = vmatprep.subr.bf16.mxu1 %v1215_v1  ;;  %1113 = vmatpush3.bf16.msra.mxu0 %v1185_v6  ;;  %v1036_v25 = vld [vmem:[%s1445_s4] ss:$0 sm:$0xff]  ;;  %v1201_v37 = vld [vmem:[%s1450_s9 + $0x18] sm:$0xff]   ;;  %v1202_v38 = vld [vmem:[%s1450_s9 + $0x10] sm:$0xff]  }
  0x13   : > { %1128 = vmatprep.mubr.msk.bf16.mxu0 %vm1216_vm0, %v1215_v1  ;;  %1114 = vmatprep.subr.bf16.mxu0 %v1215_v1  ;;  %v1200_v36 = vld [vmem:[%s1448_s7] sm:$0xff]   ;;  %v1203_v46 = vld [vmem:[%s1450_s9 + $0x8] sm:$0xff]  }
  0x14   : > { %1109 = vmatmul.mubr.msk.bf16.vlgmr.msra.gmra.mxu1 %vm526_vm2, %v455_v8  ;;  %v1037_v39 = vld [vmem:[%s1447_s6] ss:$0 sm:$0xff]  ;;  %v1205_v48 = vld [vmem:[%s1452_s11 + $0x8] sm:$0xff]  }
  0x15   : > { %1148 = vmatprep.mubr.msk.bf16.mxu1 %vm1216_vm0, %v1215_v1  ;;  %1133 = vmatpush3.bf16.msra.mxu1 %v1193_v16  ;;  %v1204_v47 = vld [vmem:[%s1450_s9] sm:$0xff]  }
  0x16   : > { %1115 = vmatpush3.bf16.msra.mxu0 %v1186_v9  ;;  %1134 = vmatprep.subr.bf16.mxu1 %v1215_v1  ;;  %v1046_v49 = vld [vmem:[%s1449_s8] ss:$0 sm:$0xff] }
  0x17   : > { %1116 = vmatprep.subr.bf16.mxu0 %v1215_v1  ;;  %v1206_v57 = vld [vmem:[%s1452_s11] sm:$0xff]  }
  0x18   : > { %v1055_v58 = vld [vmem:[%s1451_s10] ss:$0 sm:$0xff] }
  0x19   : > { %1135 = vmatpush3.bf16.msra.mxu1 %v1194_v17  ;;  %v1061_v2 = vld [vmem:[%s1453_s12] ss:$0 sm:$0xff] }
  0x1a   : > { %1117 = vmatpush3.bf16.msra.mxu0 %v1187_v10  ;;  %1136 = vmatprep.subr.bf16.mxu1 %v1215_v1 }
  0x1b   : > { %1118 = vmatprep.subr.bf16.mxu0 %v1215_v1 }
  0x1d   : > { %1137 = vmatpush3.bf16.msra.mxu1 %v1195_v18 }
  0x1e   : > { %1119 = vmatpush3.bf16.msra.mxu0 %v1188_v11  ;;  %1138 = vmatprep.subr.bf16.mxu1 %v1215_v1 }
  0x1f   : > { %1120 = vmatprep.subr.bf16.mxu0 %v1215_v1 }
  0x21   : > { %1139 = vmatpush3.bf16.msra.mxu1 %v1196_v19 }
  0x22   : > { %1121 = vmatpush3.bf16.msra.mxu0 %v1189_v12  ;;  %1140 = vmatprep.subr.bf16.mxu1 %v1215_v1 }
  0x23   : > { %1122 = vmatprep.subr.bf16.mxu0 %v1215_v1 }
  0x25   : > { %1141 = vmatpush3.bf16.msra.mxu1 %v1197_v20 }
  0x26   : > { %1123 = vmatpush3.bf16.msra.mxu0 %v1190_v13  ;;  %1142 = vmatprep.subr.bf16.mxu1 %v1215_v1 }
  0x27   : > { %1124 = vmatprep.subr.bf16.mxu0 %v1215_v1 }
  0x29   : > { %1143 = vmatpush3.bf16.msra.mxu1 %v1198_v21 }
  0x2a   : > { %1125 = vmatpush3.bf16.msra.mxu0 %v1191_v14  ;;  %1144 = vmatprep.subr.bf16.mxu1 %v1215_v1 }
  0x2b   : > { %1126 = vmatprep.subr.bf16.mxu0 %v1215_v1 }
  0x2d   : > { %1145 = vmatpush3.bf16.msra.mxu1 %v1199_v22 }
  0x2e   : > { %1127 = vmatpush3.bf16.msra.mxu0 %v1192_v15  ;;  %1146 = vmatprep.subr.bf16.mxu1 %v1215_v1 }
  0x2f   : > { %1152 = vmatprep.subr.bf16.mxu0 %v1215_v1 }
  0x31   : > { %1147 = vmatpush3.bf16.msra.mxu1 %v1200_v36 }
  0x32   : > { %1164 = vmatprep.subr.bf16.mxu1 %v1215_v1 }
  0xd1   : > { %v508_v23 = vpop.f32.mrf.mxu0 }
  0xd3   : > { %v1102_v27 = vpop.f32.mrf.mxu0 }
  0xd4   : > { %v564_v24 = vpop.f32.mrf.mxu1 }
  0xd5   : > { %v565_v26 = vadd.f32 %v564_v24, %v508_v23  ;;  %v511_v30 = vpop.f32.mrf.mxu0 }
  0xd6   : > { %v1110_v28 = vpop.f32.mrf.mxu1 }
  0xd7   : > { %v577_v29 = vadd.f32 %v1036_v25, %v565_v26  ;;  %v1103_v33 = vpop.f32.mrf.mxu0 }
  0xd8   : > { %v567_v31 = vpop.f32.mrf.mxu1 }
  0xd9   : > { %v578_v32 = vmax.f32 %v577_v29, 0.0 }
  0xda   : > { %v1111_v34 = vpop.f32.mrf.mxu1 }
  0xdb   : > { %v579_v35 = vpack.c.bf16 %v578_v32, %v578_v32 }
  0xdd   : > { %1129 = vmatmul.mubr.bf16.vlgmr.msra.gmra.mxu0 %v579_v35 }
  0xde   : > { %1160 = vmatprep.mubr.msk.bf16.mxu0 %vm1216_vm0, %v1215_v1  ;;  %1153 = vmatpush3.bf16.msra.mxu0 %v1201_v37 }
  0xdf   : > { %1154 = vmatprep.subr.bf16.mxu0 %v1215_v1 }
  0xe2   : > { %1155 = vmatpush3.bf16.msra.mxu0 %v1202_v38 }
  0xe3   : > { %1156 = vmatprep.subr.bf16.mxu0 %v1215_v1 }
  0xe6   : > { %1157 = vmatpush3.bf16.msra.mxu0 %v1203_v46 }
  0xe7   : > { %1158 = vmatprep.subr.bf16.mxu0 %v1215_v1 }
  0xea   : > { %1159 = vmatpush3.bf16.msra.mxu0 %v1204_v47 }
 0x19d   : > { %v685_v40 = vpop.f32.mrf.mxu0 }
 0x19e   : > { %v686_v41 = vadd.f32 %v1037_v39, %v685_v40 }
 0x19f   : > { %v1130_v42 = vpop.f32.mrf.mxu0 }
 0x1a0   : > { %v691_v43 = vpack.c.bf16 %v686_v41, %v686_v41 }
 0x1a1   : > { %v688_v44 = vpop.f32.mrf.mxu0 }
 0x1a2   : > { %1149 = vmatmul.mubr.bf16.vlgmr.msra.gmra.mxu1 %v691_v43 }
 0x1a3   : > { %v1131_v45 = vpop.f32.mrf.mxu0  ;;  %1168 = vmatprep.mubr.msk.bf16.mxu1 %vm1216_vm0, %v1215_v1  ;;  %1165 = vmatpush3.bf16.msra.mxu1 %v1205_v48 }
 0x1a4   : > { %1166 = vmatprep.subr.bf16.mxu1 %v1215_v1 }
 0x1a7   : > { %1167 = vmatpush3.bf16.msra.mxu1 %v1206_v57 }
 0x262   : > { %v797_v50 = vpop.f32.mrf.mxu1 }
 0x263   : > { %v798_v51 = vadd.f32 %v1046_v49, %v797_v50 }
 0x264   : > { %v1150_v52 = vpop.f32.mrf.mxu1 }
 0x265   : > { %v803_v53 = vmax.f32 %v798_v51, 0.0 }
 0x266   : > { %v800_v54 = vpop.f32.mrf.mxu1 }
 0x267   : > { %v804_v55 = vpack.c.bf16 %v803_v53, %v803_v53 }
 0x268   : > { %v1151_v56 = vpop.f32.mrf.mxu1 }
 0x269   : > { %1161 = vmatmul.mubr.msk.bf16.vlgmr.msra.gmra.mxu0 %vm844_vm3, %v804_v55 }
 0x329   : > { %v882_v59 = vpop.f32.mrf.mxu0 }
 0x32a   : > { %v883_v60 = vadd.f32 %v1055_v58, %v882_v59 }
 0x32b   : > { %v1162_v61 = vpop.f32.mrf.mxu0 }
 0x32c   : > { %v888_v62 = vmax.f32 %v883_v60, 0.0 }
 0x32d   : > { %v885_v63 = vpop.f32.mrf.mxu0 }
 0x32e   : > { %v889_v0 = vpack.c.bf16 %v888_v62, %v888_v62 }
 0x32f   : > { %v1163_v1 = vpop.f32.mrf.mxu0 }
 0x330   : > { %1169 = vmatmul.mubr.msk.bf16.vlgmr.msra.gmra.mxu1 %vm526_vm2, %v889_v0 }
 0x3f0   : > { %v950_v3 = vpop.f32.mrf.mxu1 }
 0x3f1   : > { %v951_v4 = vadd.f32 %v1061_v2, %v950_v3 }
 0x3f2   : > { %v1170_v5 = vpop.f32.mrf.mxu1 }
 0x3f3   : > { %957 = vst.msk [vmem:[%s452_s19] sm:$0xff] %vm956_vm4, %v951_v4 }
 0x3f4   : > { %v953_v6 = vpop.f32.mrf.mxu1 }
 0x3f6   : > { %v1171_v7 = vpop.f32.mrf.mxu1 }
 0x3f7 PF: > { %s23_s25 = sadd.s32 1, %s1213_s25  }
 0x3f8   : > { %p20_p4 = scmp.ge.s32.totalorder %s23_s25, 5  }
 0x3fa   :  { %22 = sbr.rel (!%p20_p4) target bundleno = 1 (0x1), region = 105 }

// kernel: tpu_custom_call.1
= control target key start
LH: loop header
LB: loop body
LE: loop exit
PB: predicated region body
PF: predicated region fallthrough
CT: control target
= control target key end

     0   :  { %s1287_s25 = smov 0   ;;  %s1441_s0 = inlined_call_operand.vmem [shape: f32[20,32], index: 0, kind: input, shape index: {}]   ;;  %s1442_s1 = inlined_call_operand.vmem [shape: f32[20,16], index: 1, kind: input, shape index: {}]   ;;  %s1443_s2 = inlined_call_operand.vmem [shape: bf16[32,128], index: 2, kind: input, shape index: {}]   ;;  %s1444_s3 = inlined_call_operand.vmem [shape: bf16[16,128], index: 3, kind: input, shape index: {}]   ;;  %s1445_s4 = inlined_call_operand.vmem [shape: f32[1,128], index: 4, kind: input, shape index: {}]   ;;  %s1446_s5 = inlined_call_operand.vmem [shape: bf16[128,128], index: 5, kind: input, shape index: {}]   ;;  %s1447_s6 = inlined_call_operand.vmem [shape: f32[1,128], index: 6, kind: input, shape index: {}]   ;;  %s1448_s7 = inlined_call_operand.vmem [shape: bf16[128,64], index: 7, kind: input, shape index: {}]   ;;  %s1449_s8 = inlined_call_operand.vmem [shape: f32[1,64], index: 8, kind: input, shape index: {}]   ;;  %s1450_s9 = inlined_call_operand.vmem [shape: bf16[64,32], index: 9, kind: input, shape index: {}]   ;;  %s1451_s10 = inlined_call_operand.vmem [shape: f32[1,32], index: 10, kind: input, shape index: {}]   ;;  %s1452_s11 = inlined_call_operand.vmem [shape: bf16[32,8], index: 11, kind: input, shape index: {}]   ;;  %s1453_s12 = inlined_call_operand.vmem [shape: f32[1,8], index: 12, kind: input, shape index: {}]   ;;  %s1454_s13 = inlined_call_operand.vmem [shape: f32[20,8], index: 13, kind: output, shape index: {}]  }
   0x1 LB: > { %s1023_s26 = sadd.s32 4294967295, %s1213_s25   ;;  %p1027_p0 = scmp.ge.s32.totalorder %s1213_s25, 1  ;;  %s1213_s25 = sphi %s1287_s25, %s23_s25  }
   0x2   : > { %p395_p1 = scmp.lt.s32.totalorder %s1213_s25, 4 }
   0x4   : > { %p396_p2 = pnand %p1027_p0, %p395_p1 }
   0x5   : > { %p441_p3 = scmp.lt.s32.totalorder (!%p396_p2), %s1023_s26, 2 }
   0x6   : > { %399 = sbr.rel (%p396_p2) target bundleno = 1015 (0x3f7), region = 72 }
   0xb   : > { %v1182_v0 = vld [vmem:[%s1443_s2 + $0x8] sm:$0xff]   ;;  %v1215_v1 = vmov 0.0   ;;  %v1183_v2 = vld [vmem:[%s1444_s3] sm:$0xff]   ;;  %vm1216_vm0 = vmmov 0   ;;  %s1456_s26 = smov (!%p441_p3, %s1023_s26), 2  ;;  %vm470_vm1 = vcmask 130048  }
   0xc   : > { %1104 = vmatprep.subr.bf16.mxu1 %v1215_v1  ;;  %1098 = vmatprep.subr.bf16.mxu0 %v1215_v1  ;;  %v1184_v3 = vld [vmem:[%s1443_s2] sm:$0xff]   ;;  %s1312_s16 = sshll.u32 %s1456_s26, 3  ;;  %vm526_vm2 = vcmask 261120   ;;  %v1185_v6 = vld [vmem:[%s1446_s5 + $0x38] sm:$0xff]   ;;  %v1186_v9 = vld [vmem:[%s1446_s5 + $0x30] sm:$0xff]   ;;  %vm844_vm3 = vcmask 523264  }
   0xd   : > { %1105 = vmatpush3.bf16.msra.mxu1 %v1182_v0  ;;  %1100 = vmatprep.mubr.msk.bf16.mxu0 %vm1216_vm0, %v1215_v1  ;;  %s448_s19 = scalar_lea.vmem %s1442_s1, %s1312_s16  ;;  %s444_s22 = scalar_lea.vmem %s1441_s0, %s1312_s16  ;;  %v1187_v10 = vld [vmem:[%s1446_s5 + $0x28] sm:$0xff]   ;;  %v1188_v11 = vld [vmem:[%s1446_s5 + $0x20] sm:$0xff]   ;;  %v1189_v12 = vld [vmem:[%s1446_s5 + $0x18] sm:$0xff]   ;;  %vm956_vm4 = vcmask 64512  }
   0xe   : > { %1099 = vmatpush3.bf16.msra.mxu0 %v1183_v2  ;;  %1106 = vmatprep.subr.bf16.mxu1 %v1215_v1  ;;  %v456_v4 = vld [vmem:[%s448_s19] sm:$0xff]  ;;  %v1190_v13 = vld [vmem:[%s1446_s5 + $0x10] sm:$0xff]   ;;  %v1191_v14 = vld [vmem:[%s1446_s5 + $0x8] sm:$0xff]   ;;  %s452_s19 = scalar_lea.vmem %s1454_s13, %s1312_s16 }
   0xf   : > { %1108 = vmatprep.mubr.msk.bf16.mxu1 %vm1216_vm0, %v1215_v1  ;;  %1112 = vmatprep.subr.bf16.mxu0 %v1215_v1  ;;  %v454_v5 = vld [vmem:[%s444_s22] sm:$0xff]  ;;  %v457_v7 = vpack.c.bf16 %v456_v4, %v456_v4  ;;  %v1193_v16 = vld [vmem:[%s1448_s7 + $0x38] sm:$0xff]   ;;  %v1194_v17 = vld [vmem:[%s1448_s7 + $0x30] sm:$0xff]  }
  0x10   : > { %v455_v8 = vpack.c.bf16 %v454_v5, %v454_v5  ;;  %v1192_v15 = vld [vmem:[%s1446_s5] sm:$0xff]   ;;  %v1195_v18 = vld [vmem:[%s1448_s7 + $0x28] sm:$0xff]   ;;  %v1197_v20 = vld [vmem:[%s1448_s7 + $0x18] sm:$0xff]  }
  0x11   : > { %1107 = vmatpush3.bf16.msra.mxu1 %v1184_v3  ;;  %1101 = vmatmul.mubr.msk.bf16.vlgmr.msra.gmra.mxu0 %vm470_vm1, %v457_v7  ;;  %v1196_v19 = vld [vmem:[%s1448_s7 + $0x20] sm:$0xff]   ;;  %v1198_v21 = vld [vmem:[%s1448_s7 + $0x10] sm:$0xff]   ;;  %v1199_v22 = vld [vmem:[%s1448_s7 + $0x8] sm:$0xff]  }
  0x12   : > { %1132 = vmatprep.subr.bf16.mxu1 %v1215_v1  ;;  %1113 = vmatpush3.bf16.msra.mxu0 %v1185_v6  ;;  %v1036_v25 = vld [vmem:[%s1445_s4] ss:$0 sm:$0xff]  ;;  %v1201_v37 = vld [vmem:[%s1450_s9 + $0x18] sm:$0xff]   ;;  %v1202_v38 = vld [vmem:[%s1450_s9 + $0x10] sm:$0xff]  }
  0x13   : > { %1128 = vmatprep.mubr.msk.bf16.mxu0 %vm1216_vm0, %v1215_v1  ;;  %1114 = vmatprep.subr.bf16.mxu0 %v1215_v1  ;;  %v1200_v36 = vld [vmem:[%s1448_s7] sm:$0xff]   ;;  %v1203_v46 = vld [vmem:[%s1450_s9 + $0x8] sm:$0xff]  }
  0x14   : > { %1109 = vmatmul.mubr.msk.bf16.vlgmr.msra.gmra.mxu1 %vm526_vm2, %v455_v8  ;;  %v1037_v39 = vld [vmem:[%s1447_s6] ss:$0 sm:$0xff]  ;;  %v1205_v48 = vld [vmem:[%s1452_s11 + $0x8] sm:$0xff]  }
  0x15   : > { %1148 = vmatprep.mubr.msk.bf16.mxu1 %vm1216_vm0, %v1215_v1  ;;  %1133 = vmatpush3.bf16.msra.mxu1 %v1193_v16  ;;  %v1204_v47 = vld [vmem:[%s1450_s9] sm:$0xff]  }
  0x16   : > { %1115 = vmatpush3.bf16.msra.mxu0 %v1186_v9  ;;  %1134 = vmatprep.subr.bf16.mxu1 %v1215_v1  ;;  %v1046_v49 = vld [vmem:[%s1449_s8] ss:$0 sm:$0xff] }
  0x17   : > { %1116 = vmatprep.subr.bf16.mxu0 %v1215_v1  ;;  %v1206_v57 = vld [vmem:[%s1452_s11] sm:$0xff]  }
  0x18   : > { %v1055_v58 = vld [vmem:[%s1451_s10] ss:$0 sm:$0xff] }
  0x19   : > { %1135 = vmatpush3.bf16.msra.mxu1 %v1194_v17  ;;  %v1061_v2 = vld [vmem:[%s1453_s12] ss:$0 sm:$0xff] }
  0x1a   : > { %1117 = vmatpush3.bf16.msra.mxu0 %v1187_v10  ;;  %1136 = vmatprep.subr.bf16.mxu1 %v1215_v1 }
  0x1b   : > { %1118 = vmatprep.subr.bf16.mxu0 %v1215_v1 }
  0x1d   : > { %1137 = vmatpush3.bf16.msra.mxu1 %v1195_v18 }
  0x1e   : > { %1119 = vmatpush3.bf16.msra.mxu0 %v1188_v11  ;;  %1138 = vmatprep.subr.bf16.mxu1 %v1215_v1 }
  0x1f   : > { %1120 = vmatprep.subr.bf16.mxu0 %v1215_v1 }
  0x21   : > { %1139 = vmatpush3.bf16.msra.mxu1 %v1196_v19 }
  0x22   : > { %1121 = vmatpush3.bf16.msra.mxu0 %v1189_v12  ;;  %1140 = vmatprep.subr.bf16.mxu1 %v1215_v1 }
  0x23   : > { %1122 = vmatprep.subr.bf16.mxu0 %v1215_v1 }
  0x25   : > { %1141 = vmatpush3.bf16.msra.mxu1 %v1197_v20 }
  0x26   : > { %1123 = vmatpush3.bf16.msra.mxu0 %v1190_v13  ;;  %1142 = vmatprep.subr.bf16.mxu1 %v1215_v1 }
  0x27   : > { %1124 = vmatprep.subr.bf16.mxu0 %v1215_v1 }
  0x29   : > { %1143 = vmatpush3.bf16.msra.mxu1 %v1198_v21 }
  0x2a   : > { %1125 = vmatpush3.bf16.msra.mxu0 %v1191_v14  ;;  %1144 = vmatprep.subr.bf16.mxu1 %v1215_v1 }
  0x2b   : > { %1126 = vmatprep.subr.bf16.mxu0 %v1215_v1 }
  0x2d   : > { %1145 = vmatpush3.bf16.msra.mxu1 %v1199_v22 }
  0x2e   : > { %1127 = vmatpush3.bf16.msra.mxu0 %v1192_v15  ;;  %1146 = vmatprep.subr.bf16.mxu1 %v1215_v1 }
  0x2f   : > { %1152 = vmatprep.subr.bf16.mxu0 %v1215_v1 }
  0x31   : > { %1147 = vmatpush3.bf16.msra.mxu1 %v1200_v36 }
  0x32   : > { %1164 = vmatprep.subr.bf16.mxu1 %v1215_v1 }
  0xd1   : > { %v508_v23 = vpop.f32.mrf.mxu0 }
  0xd3   : > { %v1102_v27 = vpop.f32.mrf.mxu0 }
  0xd4   : > { %v564_v24 = vpop.f32.mrf.mxu1 }
  0xd5   : > { %v565_v26 = vadd.f32 %v564_v24, %v508_v23  ;;  %v511_v30 = vpop.f32.mrf.mxu0 }
  0xd6   : > { %v1110_v28 = vpop.f32.mrf.mxu1 }
  0xd7   : > { %v577_v29 = vadd.f32 %v1036_v25, %v565_v26  ;;  %v1103_v33 = vpop.f32.mrf.mxu0 }
  0xd8   : > { %v567_v31 = vpop.f32.mrf.mxu1 }
  0xd9   : > { %v578_v32 = vmax.f32 %v577_v29, 0.0 }
  0xda   : > { %v1111_v34 = vpop.f32.mrf.mxu1 }
  0xdb   : > { %v579_v35 = vpack.c.bf16 %v578_v32, %v578_v32 }
  0xdd   : > { %1129 = vmatmul.mubr.bf16.vlgmr.msra.gmra.mxu0 %v579_v35 }
  0xde   : > { %1160 = vmatprep.mubr.msk.bf16.mxu0 %vm1216_vm0, %v1215_v1  ;;  %1153 = vmatpush3.bf16.msra.mxu0 %v1201_v37 }
  0xdf   : > { %1154 = vmatprep.subr.bf16.mxu0 %v1215_v1 }
  0xe2   : > { %1155 = vmatpush3.bf16.msra.mxu0 %v1202_v38 }
  0xe3   : > { %1156 = vmatprep.subr.bf16.mxu0 %v1215_v1 }
  0xe6   : > { %1157 = vmatpush3.bf16.msra.mxu0 %v1203_v46 }
  0xe7   : > { %1158 = vmatprep.subr.bf16.mxu0 %v1215_v1 }
  0xea   : > { %1159 = vmatpush3.bf16.msra.mxu0 %v1204_v47 }
 0x19d   : > { %v685_v40 = vpop.f32.mrf.mxu0 }
 0x19e   : > { %v686_v41 = vadd.f32 %v1037_v39, %v685_v40 }
 0x19f   : > { %v1130_v42 = vpop.f32.mrf.mxu0 }
 0x1a0   : > { %v691_v43 = vpack.c.bf16 %v686_v41, %v686_v41 }
 0x1a1   : > { %v688_v44 = vpop.f32.mrf.mxu0 }
 0x1a2   : > { %1149 = vmatmul.mubr.bf16.vlgmr.msra.gmra.mxu1 %v691_v43 }
 0x1a3   : > { %v1131_v45 = vpop.f32.mrf.mxu0  ;;  %1168 = vmatprep.mubr.msk.bf16.mxu1 %vm1216_vm0, %v1215_v1  ;;  %1165 = vmatpush3.bf16.msra.mxu1 %v1205_v48 }
 0x1a4   : > { %1166 = vmatprep.subr.bf16.mxu1 %v1215_v1 }
 0x1a7   : > { %1167 = vmatpush3.bf16.msra.mxu1 %v1206_v57 }
 0x262   : > { %v797_v50 = vpop.f32.mrf.mxu1 }
 0x263   : > { %v798_v51 = vadd.f32 %v1046_v49, %v797_v50 }
 0x264   : > { %v1150_v52 = vpop.f32.mrf.mxu1 }
 0x265   : > { %v803_v53 = vmax.f32 %v798_v51, 0.0 }
 0x266   : > { %v800_v54 = vpop.f32.mrf.mxu1 }
 0x267   : > { %v804_v55 = vpack.c.bf16 %v803_v53, %v803_v53 }
 0x268   : > { %v1151_v56 = vpop.f32.mrf.mxu1 }
 0x269   : > { %1161 = vmatmul.mubr.msk.bf16.vlgmr.msra.gmra.mxu0 %vm844_vm3, %v804_v55 }
 0x329   : > { %v882_v59 = vpop.f32.mrf.mxu0 }
 0x32a   : > { %v883_v60 = vadd.f32 %v1055_v58, %v882_v59 }
 0x32b   : > { %v1162_v61 = vpop.f32.mrf.mxu0 }
 0x32c   : > { %v888_v62 = vmax.f32 %v883_v60, 0.0 }
 0x32d   : > { %v885_v63 = vpop.f32.mrf.mxu0 }
 0x32e   : > { %v889_v0 = vpack.c.bf16 %v888_v62, %v888_v62 }
 0x32f   : > { %v1163_v1 = vpop.f32.mrf.mxu0 }
 0x330   : > { %1169 = vmatmul.mubr.msk.bf16.vlgmr.msra.gmra.mxu1 %vm526_vm2, %v889_v0 }
 0x3f0   : > { %v950_v3 = vpop.f32.mrf.mxu1 }
 0x3f1   : > { %v951_v4 = vadd.f32 %v1061_v2, %v950_v3 }
 0x3f2   : > { %v1170_v5 = vpop.f32.mrf.mxu1 }
 0x3f3   : > { %957 = vst.msk [vmem:[%s452_s19] sm:$0xff] %vm956_vm4, %v951_v4 }
 0x3f4   : > { %v953_v6 = vpop.f32.mrf.mxu1 }
 0x3f6   : > { %v1171_v7 = vpop.f32.mrf.mxu1 }
 0x3f7 PF: > { %s23_s25 = sadd.s32 1, %s1213_s25  }
 0x3f8   : > { %p20_p4 = scmp.ge.s32.totalorder %s23_s25, 5  }
 0x3fa   :  { %22 = sbr.rel (!%p20_p4) target bundleno = 1 (0x1), region = 105 }

</bundles_post_ra>
